<compile_context>
chip_gen: v6e
topology: v6e:2x2x1
jax: 0.10.0
libtpu: 0.0.40
codegen_flags: <defaults>
</compile_context>

<pallas_src>
import functools

import jax
import jax.numpy as jnp
import numpy as np
from jax import lax
from jax.experimental import pallas as pl
from jax.experimental.pallas import tpu as pltpu

# ---------------------------------------------------------------- constants --

_TARGET_BLOCK_BYTES = 2 << 20        # ~2 MiB input block per grid step
_VMEM_FOOTPRINT_BUDGET = 24 << 20    # resident bytes (2x-buffered io + temps)
_RESIDENT_BYTES_PER_ELEM = 40        # conservative f32 model per (D*TILE) elem
_VMEM_LIMIT_BYTES = 40 << 20         # scoped-VMEM limit handed to Mosaic
_MAX_IND_TILE = 65536                # max tile along the independent axis
_UNROLL_MAX_D = 64                   # above this, switch to bisection
_UNROLL_CHUNK_ELEMS = 8192           # keep d*chunk <= this (vreg-resident accs)
_BISECT_ITERS = 30                   # tau bracket [max-1, max] -> 2^-30 wide


# ------------------------------------------------------------- tile choice --

def _choose_tile(d, n, gran):
    """Tile size along the independent axis.

    gran = 128 when the independent axis is on lanes (sublane-D layout),
    gran = 8 when it is on sublanes (lane-D layout).
    """
    d = max(int(d), 1)
    if _RESIDENT_BYTES_PER_ELEM * d * gran > _VMEM_FOOTPRINT_BUDGET:
        # TODO(synk): D-chunked two-pass pipeline for huge reduction axes
        # (needed before D ~5k fits the v7x 64 MiB VMEM with this layout).
        raise NotImplementedError(
            f"sparsemax: reduction axis D={d} too large to keep resident in "
            "VMEM with the single-pass kernel.")
    cap = (_VMEM_FOOTPRINT_BUDGET // (_RESIDENT_BYTES_PER_ELEM * d)) // gran * gran
    tgt = (_TARGET_BLOCK_BYTES // (4 * d)) // gran * gran
    t = max(gran, min(_MAX_IND_TILE, cap, tgt))
    if n <= t:
        if n >= 2 * gran:
            # Keep >= 2 grid blocks so the "parallel" grid axis can shard
            # across the two TensorCores on v7x-class parts (megacore).
            half = (n + 1) // 2
            t = ((half + gran - 1) // gran) * gran
        else:
            t = n                      # single block covering the full extent
    return t


def _unrolled_chunk(d, tn):
    """Lane-chunk width for the unrolled path: d * chunk small enough that
    the per-chunk accumulators stay in vector registers."""
    if tn % 128 != 0:
        return tn                      # small single-block case
    tc = (_UNROLL_CHUNK_ELEMS // d) // 128 * 128
    tc = max(128, min(512, tc, tn))
    while tn % tc:                     # make tc divide tn (steps of 128)
        tc -= 128
    return tc


# ------------------------------------------------------------------ kernels --

def _make_unrolled_kernel(d, tn):
    """Sparsemax along axis 0 (sublanes) for small D.

    For every element of a column: G = #{j : z_j > z_i}, SG = sum of those
    z_j.  Element i is in the support iff 1 + G*z_i > SG (identical to the
    sorted prefix test; tie-consistent).  Lanes are processed in chunks small
    enough that z/G/SG never leave vregs.  G accumulates in f32 (exact for
    any realistic D < 2^24).
    """
    tc = _unrolled_chunk(d, tn)
    n_chunks = tn // tc

    def kernel(x_ref, o_ref):
        def process(off):
            xc = x_ref[:, pl.ds(off, tc)].astype(jnp.float32)        # (d, tc)
            mx = jnp.max(xc, axis=0, keepdims=True)                  # (1, tc)
            zc = xc - mx                                             # input -= max
            g = jnp.zeros_like(zc)
            sg = jnp.zeros_like(zc)
            for j in range(d):                                       # fully unrolled
                zj = zc[j:j + 1, :]                                  # sublane slice
                gt = (zj > zc).astype(jnp.float32)
                g = g + gt
                sg = sg + gt * zj
            cond = ((1.0 + g * zc) > sg).astype(jnp.float32)
            k = jnp.sum(cond, axis=0, keepdims=True)                 # support >= 1
            ssum = jnp.sum(cond * zc, axis=0, keepdims=True)
            # Exact division (NOT approx reciprocal) so sum-to-1 stays tight.
            tau = (ssum - 1.0) / k
            # Garbage lanes of a partial tail block may yield inf/NaN here;
            # harmless on TPU and dropped at writeback.
            o_ref[:, pl.ds(off, tc)] = jnp.maximum(zc - tau, 0.0).astype(o_ref.dtype)

        if n_chunks == 1:
            process(0)
        else:
            @pl.loop(0, n_chunks)
            def _(c):
                process(pl.multiple_of(c * tc, 128))

    return kernel


def _make_bisect_kernel(axis):
    """Sparsemax via fixed-iteration bisection on tau (O(iters * D) work).

    f(t) = sum(relu(z - t)) - 1 is decreasing with its root tau in
    [max(z)-1, max(z)].  After _BISECT_ITERS halvings the support mask is
    recovered from the upper bracket (which always contains the max element)
    and k / sum / tau are recomputed exactly from that mask.
    """
    def kernel(x_ref, o_ref):
        x = x_ref[...].astype(jnp.float32)
        maxv = jnp.max(x, axis=axis, keepdims=True)

        def body(_, carry):
            lo, hi = carry
            mid = 0.5 * (lo + hi)
            mass = jnp.sum(jnp.maximum(x - (maxv + mid), 0.0),
                           axis=axis, keepdims=True)
            go_right = mass > 1.0                       # tau lies above mid
            return (jnp.where(go_right, mid, lo),
                    jnp.where(go_right, hi, mid))

        lo, hi = lax.fori_loop(
            0, _BISECT_ITERS, body,
            (jnp.full_like(maxv, -1.0), jnp.zeros_like(maxv)))

        supp = x >= (maxv + hi)                         # max element always in
        k = jnp.sum(supp.astype(jnp.float32), axis=axis, keepdims=True)
        ssum = jnp.sum(jnp.where(supp, x - maxv, 0.0), axis=axis, keepdims=True)
        tau = (ssum - 1.0) / k                          # exact recompute
        o_ref[...] = jnp.maximum(x - maxv - tau, 0.0).astype(o_ref.dtype)

    return kernel


# ----------------------------------------------------------------- wrappers --

def _compiler_params():
    return pltpu.CompilerParams(dimension_semantics=("parallel",),
                                vmem_limit_bytes=_VMEM_LIMIT_BYTES)


def _sparsemax_sublane(x2):
    """Sparsemax along axis 0 of (D, N): D on sublanes, N on lanes."""
    d, n = x2.shape
    tn = _choose_tile(d, n, 128)
    kernel = (_make_unrolled_kernel(d, tn) if d <= _UNROLL_MAX_D
              else _make_bisect_kernel(axis=0))
    return pl.pallas_call(
        kernel,
        out_shape=jax.ShapeDtypeStruct((d, n), x2.dtype),
        grid=(pl.cdiv(n, tn),),
        in_specs=[pl.BlockSpec((d, tn), lambda i: (0, i))],
        out_specs=pl.BlockSpec((d, tn), lambda i: (0, i)),
        compiler_params=_compiler_params(),
    )(x2)


def _sparsemax_lane(x2):
    """Sparsemax along axis 1 of (N, D): D on lanes (transpose-free dim=-1)."""
    n, d = x2.shape
    tr = _choose_tile(d, n, 8)
    return pl.pallas_call(
        _make_bisect_kernel(axis=-1),
        out_shape=jax.ShapeDtypeStruct((n, d), x2.dtype),
        grid=(pl.cdiv(n, tr),),
        in_specs=[pl.BlockSpec((tr, d), lambda i: (i, 0))],
        out_specs=pl.BlockSpec((tr, d), lambda i: (i, 0)),
        compiler_params=_compiler_params(),
    )(x2)


@functools.partial(jax.jit, static_argnames=("dim",))
def sparsemax(x, dim=0):
    """Equivalent of Sparsemax(dim).forward(x) — any shape, any axis."""
    ndim = x.ndim
    dim = dim % ndim
    d = x.shape[dim]

    if dim == ndim - 1 and d % 128 == 0:
        # Reduce along the last (lane) axis directly: no transpose round-trip.
        n = x.size // d
        return _sparsemax_lane(x.reshape(n, d)).reshape(x.shape)

    # Default layout: sparsemax axis on sublanes, everything else on lanes.
    # For the PyTorch-default dim=0 the moveaxis/reshape are no-copy views.
    # TODO(synk): masked lane-axis variant so dim=-1 with D % 128 != 0 also
    # avoids the XLA transpose before/after the kernel.
    xt = jnp.moveaxis(x, dim, 0)
    tail = xt.shape[1:]
    n = int(np.prod(tail)) if tail else 1
    out2 = _sparsemax_sublane(xt.reshape(d, n))
    return jnp.moveaxis(out2.reshape((d,) + tail), 0, dim)


# ---------------------------------------------------------------- reference --

def sparsemax_reference(x, dim=0):
    """Pure-JAX port of the PyTorch sort-based forward, for verification."""
    dim = dim % x.ndim
    z = x - jnp.max(x, axis=dim, keepdims=True)
    z_srt = -jnp.sort(-z, axis=dim)                    # descending sort
    z_cum = jnp.cumsum(z_srt, axis=dim) - 1.0
    d = x.shape[dim]
    view = [1] * x.ndim
    view[dim] = d
    rho = jnp.arange(1, d + 1, dtype=z.dtype).reshape(view)
    support = rho * z_srt > z_cum
    k = jnp.sum(support, axis=dim, keepdims=True)
    tau = jnp.take_along_axis(z_cum, k - 1, axis=dim) / k.astype(z.dtype)
    return jnp.maximum(z - tau, 0.0)


# --------------------------------------------------------------------- main --

if __name__ == "__main__":
    key = jax.random.PRNGKey(0)
    k1, k2, k3, k4, k5 = jax.random.split(key, 5)

    def check(x, dim):
        y = jax.block_until_ready(sparsemax(x, dim=dim))
        np.testing.assert_allclose(np.asarray(y),
                                   np.asarray(sparsemax_reference(x, dim)),
                                   rtol=1e-5, atol=1e-5)
        return y

    # 1) Module default — Sparsemax(dim=0) on a (seq=8, hidden=32) input.
    x1 = jax.random.normal(k1, (8, 32), dtype=jnp.float32) * 2.0
    y1 = check(x1, 0)
    np.testing.assert_allclose(np.asarray(jnp.sum(y1, axis=0)),
                               np.ones((32,), np.float32),
                               rtol=1e-5, atol=1e-5)

    # 2) Non-default axis, D=16 (not a multiple of 128): moveaxis fallback.
    check(jax.random.normal(k2, (2, 4, 16), dtype=jnp.float32), -1)

    # 3) Multi-block grid (megacore split) on the small-D unrolled path.
    check(jax.random.normal(k3, (8, 1536), dtype=jnp.float32), 0)

    # 4) Bisection path (D > 64) along sublanes, 2 grid blocks.
    check(jax.random.normal(k4, (512, 256), dtype=jnp.float32) * 1.5, 0)

    # 5) Lane-layout path: dim=-1 with D a multiple of 128 (no transpose).
    check(jax.random.normal(k5, (16, 256), dtype=jnp.float32), -1)

    print("KERNEL_OK")
</pallas_src>

<mosaic_0001>
module attributes {stable_mosaic.version = 11 : i64} {
  func.func @kernel(%arg0: i32, %arg1: memref<8x32xf32, #tpu.memory_space<vmem>>, %arg2: memref<8x32xf32, #tpu.memory_space<vmem>>) attributes {dimension_semantics = [#tpu.dimension_semantics<parallel>], iteration_bounds = array<i64: 1>, scalar_prefetch = 0 : i64, scratch_operands = 0 : i64, tpu.core_type = #tpu.core_type<tc>, window_params = [{transform_indices = @transform_0, window_bounds = array<i64: 8, 32>}, {transform_indices = @transform_1, window_bounds = array<i64: 8, 32>}]} {
    %c0 = arith.constant 0 : index
    %c0_0 = arith.constant 0 : index
    %0 = vector.load %arg1[%c0, %c0_0] : memref<8x32xf32, #tpu.memory_space<vmem>>, vector<8x32xf32>
    %cst = arith.constant dense<0xFF800000> : vector<32xf32>
    %1 = vector.multi_reduction <maximumf>, %0, %cst [0] : vector<8x32xf32> to vector<32xf32>
    %2 = vector.shape_cast %1 : vector<32xf32> to vector<1x32xf32>
    %3 = vector.broadcast %2 : vector<1x32xf32> to vector<8x32xf32>
    %4 = arith.subf %0, %3 : vector<8x32xf32>
    %cst_1 = arith.constant 0.000000e+00 : f32
    %5 = vector.broadcast %cst_1 : f32 to vector<8x32xf32>
    %cst_2 = arith.constant 0.000000e+00 : f32
    %6 = vector.broadcast %cst_2 : f32 to vector<8x32xf32>
    %7 = vector.extract_strided_slice %4 {offsets = [0, 0], sizes = [1, 32], strides = [1, 1]} : vector<8x32xf32> to vector<1x32xf32>
    %8 = vector.broadcast %7 : vector<1x32xf32> to vector<8x32xf32>
    %9 = arith.cmpf ogt, %8, %4 : vector<8x32xf32>
    %10 = arith.extui %9 : vector<8x32xi1> to vector<8x32xi32>
    %11 = arith.sitofp %10 : vector<8x32xi32> to vector<8x32xf32>
    %12 = arith.addf %5, %11 : vector<8x32xf32>
    %13 = vector.broadcast %7 : vector<1x32xf32> to vector<8x32xf32>
    %14 = arith.mulf %11, %13 : vector<8x32xf32>
    %15 = arith.addf %6, %14 : vector<8x32xf32>
    %16 = vector.extract_strided_slice %4 {offsets = [1, 0], sizes = [1, 32], strides = [1, 1]} : vector<8x32xf32> to vector<1x32xf32>
    %17 = vector.broadcast %16 : vector<1x32xf32> to vector<8x32xf32>
    %18 = arith.cmpf ogt, %17, %4 : vector<8x32xf32>
    %19 = arith.extui %18 : vector<8x32xi1> to vector<8x32xi32>
    %20 = arith.sitofp %19 : vector<8x32xi32> to vector<8x32xf32>
    %21 = arith.addf %12, %20 : vector<8x32xf32>
    %22 = vector.broadcast %16 : vector<1x32xf32> to vector<8x32xf32>
    %23 = arith.mulf %20, %22 : vector<8x32xf32>
    %24 = arith.addf %15, %23 : vector<8x32xf32>
    %25 = vector.extract_strided_slice %4 {offsets = [2, 0], sizes = [1, 32], strides = [1, 1]} : vector<8x32xf32> to vector<1x32xf32>
    %26 = vector.broadcast %25 : vector<1x32xf32> to vector<8x32xf32>
    %27 = arith.cmpf ogt, %26, %4 : vector<8x32xf32>
    %28 = arith.extui %27 : vector<8x32xi1> to vector<8x32xi32>
    %29 = arith.sitofp %28 : vector<8x32xi32> to vector<8x32xf32>
    %30 = arith.addf %21, %29 : vector<8x32xf32>
    %31 = vector.broadcast %25 : vector<1x32xf32> to vector<8x32xf32>
    %32 = arith.mulf %29, %31 : vector<8x32xf32>
    %33 = arith.addf %24, %32 : vector<8x32xf32>
    %34 = vector.extract_strided_slice %4 {offsets = [3, 0], sizes = [1, 32], strides = [1, 1]} : vector<8x32xf32> to vector<1x32xf32>
    %35 = vector.broadcast %34 : vector<1x32xf32> to vector<8x32xf32>
    %36 = arith.cmpf ogt, %35, %4 : vector<8x32xf32>
    %37 = arith.extui %36 : vector<8x32xi1> to vector<8x32xi32>
    %38 = arith.sitofp %37 : vector<8x32xi32> to vector<8x32xf32>
    %39 = arith.addf %30, %38 : vector<8x32xf32>
    %40 = vector.broadcast %34 : vector<1x32xf32> to vector<8x32xf32>
    %41 = arith.mulf %38, %40 : vector<8x32xf32>
    %42 = arith.addf %33, %41 : vector<8x32xf32>
    %43 = vector.extract_strided_slice %4 {offsets = [4, 0], sizes = [1, 32], strides = [1, 1]} : vector<8x32xf32> to vector<1x32xf32>
    %44 = vector.broadcast %43 : vector<1x32xf32> to vector<8x32xf32>
    %45 = arith.cmpf ogt, %44, %4 : vector<8x32xf32>
    %46 = arith.extui %45 : vector<8x32xi1> to vector<8x32xi32>
    %47 = arith.sitofp %46 : vector<8x32xi32> to vector<8x32xf32>
    %48 = arith.addf %39, %47 : vector<8x32xf32>
    %49 = vector.broadcast %43 : vector<1x32xf32> to vector<8x32xf32>
    %50 = arith.mulf %47, %49 : vector<8x32xf32>
    %51 = arith.addf %42, %50 : vector<8x32xf32>
    %52 = vector.extract_strided_slice %4 {offsets = [5, 0], sizes = [1, 32], strides = [1, 1]} : vector<8x32xf32> to vector<1x32xf32>
    %53 = vector.broadcast %52 : vector<1x32xf32> to vector<8x32xf32>
    %54 = arith.cmpf ogt, %53, %4 : vector<8x32xf32>
    %55 = arith.extui %54 : vector<8x32xi1> to vector<8x32xi32>
    %56 = arith.sitofp %55 : vector<8x32xi32> to vector<8x32xf32>
    %57 = arith.addf %48, %56 : vector<8x32xf32>
    %58 = vector.broadcast %52 : vector<1x32xf32> to vector<8x32xf32>
    %59 = arith.mulf %56, %58 : vector<8x32xf32>
    %60 = arith.addf %51, %59 : vector<8x32xf32>
    %61 = vector.extract_strided_slice %4 {offsets = [6, 0], sizes = [1, 32], strides = [1, 1]} : vector<8x32xf32> to vector<1x32xf32>
    %62 = vector.broadcast %61 : vector<1x32xf32> to vector<8x32xf32>
    %63 = arith.cmpf ogt, %62, %4 : vector<8x32xf32>
    %64 = arith.extui %63 : vector<8x32xi1> to vector<8x32xi32>
    %65 = arith.sitofp %64 : vector<8x32xi32> to vector<8x32xf32>
    %66 = arith.addf %57, %65 : vector<8x32xf32>
    %67 = vector.broadcast %61 : vector<1x32xf32> to vector<8x32xf32>
    %68 = arith.mulf %65, %67 : vector<8x32xf32>
    %69 = arith.addf %60, %68 : vector<8x32xf32>
    %70 = vector.extract_strided_slice %4 {offsets = [7, 0], sizes = [1, 32], strides = [1, 1]} : vector<8x32xf32> to vector<1x32xf32>
    %71 = vector.broadcast %70 : vector<1x32xf32> to vector<8x32xf32>
    %72 = arith.cmpf ogt, %71, %4 : vector<8x32xf32>
    %73 = arith.extui %72 : vector<8x32xi1> to vector<8x32xi32>
    %74 = arith.sitofp %73 : vector<8x32xi32> to vector<8x32xf32>
    %75 = arith.addf %66, %74 : vector<8x32xf32>
    %76 = vector.broadcast %70 : vector<1x32xf32> to vector<8x32xf32>
    %77 = arith.mulf %74, %76 : vector<8x32xf32>
    %78 = arith.addf %69, %77 : vector<8x32xf32>
    %79 = arith.mulf %75, %4 : vector<8x32xf32>
    %cst_3 = arith.constant 1.000000e+00 : f32
    %80 = vector.broadcast %cst_3 : f32 to vector<8x32xf32>
    %81 = arith.addf %80, %79 : vector<8x32xf32>
    %82 = arith.cmpf ogt, %81, %78 : vector<8x32xf32>
    %83 = arith.extui %82 : vector<8x32xi1> to vector<8x32xi32>
    %84 = arith.sitofp %83 : vector<8x32xi32> to vector<8x32xf32>
    %cst_4 = arith.constant dense<0.000000e+00> : vector<32xf32>
    %85 = vector.multi_reduction <add>, %84, %cst_4 [0] : vector<8x32xf32> to vector<32xf32>
    %86 = vector.shape_cast %85 : vector<32xf32> to vector<1x32xf32>
    %87 = arith.mulf %84, %4 : vector<8x32xf32>
    %cst_5 = arith.constant dense<0.000000e+00> : vector<32xf32>
    %88 = vector.multi_reduction <add>, %87, %cst_5 [0] : vector<8x32xf32> to vector<32xf32>
    %89 = vector.shape_cast %88 : vector<32xf32> to vector<1x32xf32>
    %cst_6 = arith.constant 1.000000e+00 : f32
    %90 = vector.broadcast %cst_6 : f32 to vector<1x32xf32>
    %91 = arith.subf %89, %90 : vector<1x32xf32>
    %92 = arith.divf %91, %86 : vector<1x32xf32>
    %93 = vector.broadcast %92 : vector<1x32xf32> to vector<8x32xf32>
    %94 = arith.subf %4, %93 : vector<8x32xf32>
    %cst_7 = arith.constant 0.000000e+00 : f32
    %95 = vector.broadcast %cst_7 : f32 to vector<8x32xf32>
    %96 = arith.maximumf %94, %95 : vector<8x32xf32>
    %c0_8 = arith.constant 0 : index
    %c0_9 = arith.constant 0 : index
    %97 = vector.load %arg2[%c0_8, %c0_9] : memref<8x32xf32, #tpu.memory_space<vmem>>, vector<8x32xf32>
    tpu.vector_store %arg2[%c0_8, %c0_9], %96 {strides = array<i32>} : memref<8x32xf32, #tpu.memory_space<vmem>>, vector<8x32xf32>,
    return
  }
  func.func @transform_0(%arg0: i32) -> (i32, i32) {
    %c0_i32 = arith.constant 0 : i32
    %c0_i32_0 = arith.constant 0 : i32
    return %c0_i32, %arg0 : i32, i32
  }
  func.func @transform_1(%arg0: i32) -> (i32, i32) {
    %c0_i32 = arith.constant 0 : i32
    %c0_i32_0 = arith.constant 0 : i32
    return %c0_i32, %arg0 : i32, i32
  }
}

</mosaic_0001>

<bundles_post_ra>
// kernel: sparsemax.1
= control target key start
LH: loop header
LB: loop body
LE: loop exit
PB: predicated region body
PF: predicated region fallthrough
CT: control target
= control target key end

     0   :  { %6 = vsyncpa [#allocation3], 0  ;;  %s255_s0 = inlined_call_operand.hbm [shape: f32[8,32], index: 0, kind: input, shape index: {}]   ;;  %s256_s1 = inlined_call_operand.hbm [shape: f32[8,32], index: 1, kind: output, shape index: {}]  }
   0x1   :  { %7 = vsyncpa [#allocation4], 0  ;;  %s211_s6 = smov [#allocation2]  }
   0x2   :  { %s14_s7 = sshll.u32 %s211_s6, 4  ;;  %s15_s7 = int_to_ptr.vmem [resolvable:$true] %s14_s7 }
   0x3   :  { %s175_s8 = scalar_lea.vmem %s15_s7, 128  ;;  %p180_p1 = scmp.lt.s32.totalorder %s15_s7, %s15_s7 }
   0x4   :  { %p176_p0 = scmp.ne.s32.totalorder %s15_s7, %s175_s8  ;;  %p181_p2 = scmp.lt.s32.totalorder %s175_s8, %s175_s8 }
   0x6   :  { %p182_p3 = por %p181_p2, %p180_p1 }
   0x8   :  { %p183_p4 = pnand %p182_p3, %p176_p0 }
   0xa   :  { %186 = shalt.err (!%p183_p4)
}
   0xb   :  { %17 = dma.hbm_to_vmem [thread:$0]  %s255_s0, 128, %s15_s7, [#allocation3]  }
   0xc   :  { %207 = dma.done.wait [#allocation3], 128  }
   0xd   :  { %208 = vsyncadd [#allocation3], 4294967168  ;;  %vm22_vm0 = vcmask 261120   ;;  %v21_v0 = vld [vmem:[#allocation2] sm:$0xff]  ;;  %v31_v3 = vlaneseq  ;;  %v212_v25 = vmov 0.0   ;;  %s213_s0 = smov [#allocation5]  }
   0xe   :  { %v23_v1 = vsel %vm22_vm0, %v21_v0, -inf  ;;  %s143_s11 = sshll.u32 %s213_s0, 4  ;;  %s144_s11 = int_to_ptr.vmem [resolvable:$true] %s143_s11 }
   0xf   :  { %v24_v2 = vrot.slane %v23_v1, 4  ;;  %v32_v6 = vshrl.u32 %v31_v3, 7  ;;  %s187_s12 = scalar_lea.vmem %s144_s11, 128  ;;  %p192_p6 = scmp.lt.s32.totalorder %s144_s11, %s144_s11 }
  0x10   :  { %p188_p5 = scmp.ne.s32.totalorder %s144_s11, %s187_s12  ;;  %p193_p7 = scmp.lt.s32.totalorder %s187_s12, %s187_s12 }
  0x11   :  { %v25_v4 = vmax.f32 %v23_v1, %v24_v2  ;;  %v33_v9 = vsub.s32 0, %v32_v6  ;;  %v43_v11 = vsub.s32 1, %v32_v6  ;;  %v53_v12 = vsub.s32 2, %v32_v6 }
  0x12   :  { %v63_v13 = vsub.s32 3, %v32_v6  ;;  %v73_v14 = vsub.s32 4, %v32_v6  ;;  %v83_v15 = vsub.s32 5, %v32_v6  ;;  %v93_v17 = vsub.s32 6, %v32_v6  ;;  %p194_p8 = por %p193_p7, %p192_p6 }
  0x13   :  { %v26_v5 = vrot.slane %v25_v4, 2  ;;  %v103_v24 = vsub.s32 7, %v32_v6 }
  0x14   :  { %p195_p9 = pnand %p194_p8, %p188_p5 }
  0x15   :  { %v27_v7 = vmax.f32 %v25_v4, %v26_v5 }
  0x17   :  { %v28_v8 = vrot.slane %v27_v7, 1 }
  0x19   :  { %v29_v10 = vmax.f32 %v27_v7, %v28_v8 }
  0x1b   :  { %v228_v16 = vsub.f32 %v21_v0, %v29_v10 }
  0x1d   :  { %v34_v18 = vrot.slane %v228_v16, %v33_v9  ;;  %v44_v19 = vrot.slane %v228_v16, %v43_v11  ;;  %v54_v20 = vrot.slane %v228_v16, %v53_v12  ;;  %v64_v21 = vrot.slane %v228_v16, %v63_v13 }
  0x1e   :  { %v74_v22 = vrot.slane %v228_v16, %v73_v14  ;;  %v84_v23 = vrot.slane %v228_v16, %v83_v15  ;;  %v94_v29 = vrot.slane %v228_v16, %v93_v17  ;;  %v104_v35 = vrot.slane %v228_v16, %v103_v24 }
  0x1f   :  { %vm35_vm1 = vcmp.gt.f32.partialorder %v34_v18, %v228_v16  ;;  %vm45_vm2 = vcmp.gt.f32.partialorder %v44_v19, %v228_v16  ;;  %vm55_vm3 = vcmp.gt.f32.partialorder %v54_v20, %v228_v16  ;;  %vm65_vm4 = vcmp.gt.f32.partialorder %v64_v21, %v228_v16 }
  0x20   :  { %v152_v26 = vsel %vm35_vm1, 1.0, %v212_v25  ;;  %v153_v27 = vsel %vm45_vm2, 1.0, %v212_v25  ;;  %v154_v28 = vsel %vm55_vm3, 1.0, %v212_v25  ;;  %v155_v34 = vsel %vm65_vm4, 1.0, %v212_v25 }
  0x21   :  { %v39_v30 = vmul.f32 %v152_v26, %v34_v18  ;;  %v48_v31 = vadd.f32 %v153_v27, %v152_v26  ;;  %v49_v32 = vmul.f32 %v153_v27, %v44_v19  ;;  %v59_v33 = vmul.f32 %v154_v28, %v54_v20 }
  0x22   :  { %vm75_vm5 = vcmp.gt.f32.partialorder %v74_v22, %v228_v16  ;;  %v69_v38 = vmul.f32 %v155_v34, %v64_v21  ;;  %vm85_vm6 = vcmp.gt.f32.partialorder %v84_v23, %v228_v16  ;;  %vm95_vm7 = vcmp.gt.f32.partialorder %v94_v29, %v228_v16 }
  0x23   :  { %v50_v36 = vadd.f32 %v49_v32, %v39_v30  ;;  %v58_v37 = vadd.f32 %v154_v28, %v48_v31  ;;  %v156_v39 = vsel %vm75_vm5, 1.0, %v212_v25  ;;  %v157_v43 = vsel %vm85_vm6, 1.0, %v212_v25 }
  0x24   :  { %v79_v42 = vmul.f32 %v156_v39, %v74_v22  ;;  %v89_v46 = vmul.f32 %v157_v43, %v84_v23  ;;  %vm105_vm8 = vcmp.gt.f32.partialorder %v104_v35, %v228_v16  ;;  %v158_v47 = vsel %vm95_vm7, 1.0, %v212_v25 }
  0x25   :  { %v60_v40 = vadd.f32 %v59_v33, %v50_v36  ;;  %v68_v41 = vadd.f32 %v155_v34, %v58_v37  ;;  %v99_v50 = vmul.f32 %v158_v47, %v94_v29  ;;  %v159_v51 = vsel %vm105_vm8, 1.0, %v212_v25 }
  0x26   :  { %v109_v54 = vmul.f32 %v159_v51, %v104_v35 }
  0x27   :  { %v70_v44 = vadd.f32 %v69_v38, %v60_v40  ;;  %v78_v45 = vadd.f32 %v156_v39, %v68_v41 }
  0x29   :  { %v80_v48 = vadd.f32 %v79_v42, %v70_v44  ;;  %v88_v49 = vadd.f32 %v157_v43, %v78_v45 }
  0x2b   :  { %v90_v52 = vadd.f32 %v89_v46, %v80_v48  ;;  %v98_v53 = vadd.f32 %v158_v47, %v88_v49 }
  0x2d   :  { %v100_v55 = vadd.f32 %v99_v50, %v90_v52  ;;  %v108_v56 = vadd.f32 %v159_v51, %v98_v53 }
  0x2f   :  { %v110_v57 = vadd.f32 %v109_v54, %v100_v55  ;;  %v111_v58 = vmul.f32 %v108_v56, %v228_v16 }
  0x31   :  { %v112_v59 = vadd.f32 1.0, %v111_v58 }
  0x33   :  { %vm113_vm9 = vcmp.gt.f32.partialorder %v112_v59, %v110_v57 }
  0x34   :  { %v160_v60 = vsel %vm113_vm9, 1.0, %v212_v25 }
  0x35   :  { %v116_v61 = vsel %vm22_vm0, %v160_v60, 0.0  ;;  %v123_v62 = vmul.f32 %v160_v60, %v228_v16 }
  0x36   :  { %v117_v63 = vrot.slane %v116_v61, 4 }
  0x37   :  { %v124_v0 = vsel %vm22_vm0, %v123_v62, 0.0 }
  0x38   :  { %v118_v1 = vadd.f32 %v117_v63, %v116_v61  ;;  %v125_v2 = vrot.slane %v124_v0, 4 }
  0x3a   :  { %v119_v3 = vrot.slane %v118_v1, 2  ;;  %v126_v4 = vadd.f32 %v125_v2, %v124_v0 }
  0x3c   :  { %v120_v5 = vadd.f32 %v119_v3, %v118_v1  ;;  %v127_v6 = vrot.slane %v126_v4, 2 }
  0x3e   :  { %v121_v7 = vrot.slane %v120_v5, 1  ;;  %v128_v9 = vadd.f32 %v127_v6, %v126_v4 }
  0x40   :  { %v122_v8 = vadd.f32 %v121_v7, %v120_v5  ;;  %v129_v10 = vrot.slane %v128_v9, 1 }
  0x42   :  { %165 = vrcp.f32 %v122_v8  ;;  %v130_v11 = vadd.f32 %v129_v10, %v128_v9 }
  0x44   :  { %v161_v12 = vadd.f32 -1.0, %v130_v11 }
  0x4f   :  { %v166_v13 = vpop.eup %165 }
  0x50   :  { %v133_v14 = vmul.f32 %v166_v13, %v161_v12 }
  0x52   :  { %v134_v15 = vsub.f32 %v228_v16, %v133_v14 }
  0x54   :  { %v135_v17 = vmax.f32 %v134_v15, 0.0 }
  0x56   :  { %136 = vst.msk [vmem:[#allocation5] sm:$0xff] %vm22_vm0, %v135_v17 }
  0x57   :  { %198 = shalt.err (!%p195_p9)
}
  0x58   :  { %146 = dma.vmem_to_hbm [thread:$0]  %s144_s11, 128, %s256_s1, [#allocation4]  }
  0x59   :  { %209 = dma.done.wait [#allocation4], 128  }
  0x5a   :  { %210 = vsyncadd [#allocation4], 4294967168 }
  0x5b   :  { %150 = vsyncpa [#allocation3], 1 }
  0x5c   :  { %151 = vsyncpa [#allocation4], 1 }

</bundles_post_ra>
